<compile_context>
chip_gen: v6e
topology: v6e:2x2x1
jax: 0.10.0
libtpu: 0.0.40
codegen_flags: <defaults>
</compile_context>

<pallas_src>
import functools

import jax
import jax.numpy as jnp
from jax import lax
from jax.experimental import pallas as pl
from jax.experimental.pallas import tpu as pltpu


def _round_up(x, n):
    return (x + n - 1) // n * n


@functools.lru_cache(maxsize=1)
def _tpu_config():
    """(vmem_budget_bytes, tensorcores_per_device, tm_default, tf_default).

    Best-effort generation detection with safe fallbacks so the kernel still
    compiles and runs on unknown parts.
    """
    phys = None
    try:
        phys = int(pltpu.get_tpu_info().vmem_capacity_bytes)
    except Exception:
        phys = None

    kind = ""
    try:
        kind = jax.devices()[0].device_kind.lower()
    except Exception:
        pass
    is_v7 = "7" in kind

    if phys is None:
        if is_v7:
            phys = 64 * 1024 * 1024
        elif ("v6" in kind) or ("v5" in kind):
            phys = 128 * 1024 * 1024
        else:
            phys = 64 * 1024 * 1024            # conservative for unknown parts
    if is_v7:
        phys = min(phys, 64 * 1024 * 1024)     # 64 MiB per TensorCore on v7x

    budget = int(phys * 0.82)                  # headroom for Mosaic scratch
    cores = 2 if is_v7 else 1                  # v7x: 2 TCs share the grid
    big_vmem = phys >= 96 * 1024 * 1024
    # Bigger token tile -> more FLOP per streamed weight byte (HBM roofline);
    # bigger ffn tile -> fewer accumulator read-modify-write passes.
    tm_default = 1024 if big_vmem else 512
    tf_default = 1024 if big_vmem else 512
    return budget, cores, tm_default, tf_default


def _footprint_bytes(tm, tf, hp, xb, wb, ob):
    # Double-buffered BlockSpec inputs/outputs + f32 accumulator scratch.
    return (2 * tm * hp * xb          # x tile
            + 2 * hp * tf * wb        # W1 tile
            + 2 * 8 * tf * wb         # b1 tile (sublane-padded)
            + 2 * tf * hp * wb        # W2 tile
            + 2 * 8 * hp * wb         # b2
            + 2 * tm * hp * ob        # out tile
            + tm * hp * 4)            # f32 accumulator


def _ffn_kernel(x_ref, w1_ref, b1_ref, w2_ref, b2_ref, o_ref, acc_ref):
    # x_ref:  (tm, Hp)   token tile (resident across the ffn axis)
    # w1_ref: (Hp, tf)   first-layer weight tile
    # b1_ref: (1, tf)
    # w2_ref: (tf, Hp)   second-layer weight tile
    # b2_ref: (1, Hp)
    # o_ref:  (tm, Hp)
    # acc_ref: f32 (tm, Hp) scratch accumulator for the second matmul
    j = pl.program_id(1)

    # layer1 partial on the MXU: native-dtype operands, f32 accumulation.
    h = jnp.dot(x_ref[...], w1_ref[...], preferred_element_type=jnp.float32)
    h = h + b1_ref[...].astype(jnp.float32)

    # Exact GELU (PyTorch nn.GELU default, approximate='none'), kept in f32.
    h = 0.5 * h * (1.0 + lax.erf(h * jnp.float32(0.7071067811865476)))

    # layer2 partial: first step writes the accumulator directly (no zero-fill
    # pass); later steps accumulate.
    part = jnp.dot(h.astype(w2_ref.dtype), w2_ref[...],
                   preferred_element_type=jnp.float32)

    @pl.when(j == 0)
    def _():
        acc_ref[...] = part

    @pl.when(j > 0)
    def _():
        acc_ref[...] = acc_ref[...] + part

    @pl.when(j == pl.num_programs(1) - 1)
    def _():
        o_ref[...] = (acc_ref[...]
                      + b2_ref[...].astype(jnp.float32)).astype(o_ref.dtype)


@functools.partial(jax.jit, static_argnames=("tm", "tf"))
def ffn_pallas(x, w1, b1, w2, b2, *, tm=None, tf=None):
    """y = gelu(x @ w1 + b1) @ w2 + b2.

    x: [..., hidden];  w1: [hidden, ffn];  b1: [ffn];
    w2: [ffn, hidden]; b2: [hidden].
    (PyTorch stores Linear weights as [out, in]; pass them transposed.)
    """
    orig_shape = x.shape
    hidden = orig_shape[-1]
    ffn = w1.shape[1]

    x2d = x.reshape(-1, hidden)
    m = x2d.shape[0]

    budget, cores, tm_def, tf_def = _tpu_config()
    tm_target = tm if tm is not None else tm_def
    tf_target = tf if tf is not None else tf_def

    xb = jnp.dtype(x.dtype).itemsize
    wb = jnp.dtype(w1.dtype).itemsize
    ob = xb

    # Sublane multiple for the token axis: 8 (f32) / 16 (bf16) / 32 (int8).
    sub = max(8, 32 // xb)
    tm_target = max(sub, _round_up(tm_target, sub))
    tf_target = max(128, _round_up(tf_target, 128))

    # Feature dims padded to 128 lanes (lane-dense, unmasked vector stores).
    hp = _round_up(hidden, 128)
    fp = _round_up(ffn, 128)
    mp = _round_up(m, sub)

    # Token tile: as large as possible -- weights are re-streamed from HBM once
    # per token tile, so arithmetic intensity ~ tm FLOP per weight byte.
    tm_eff = min(tm_target, mp)
    # On multi-TensorCore parts make sure the 'parallel' token axis has at
    # least two tiles so neither core sits idle for small token counts.
    if cores >= 2 and mp <= tm_eff and mp >= 2 * sub:
        tm_eff = _round_up((mp + 1) // 2, sub)

    tf_eff = min(tf_target, fp)

    # Shrink to the VMEM budget: tf first (preserves arithmetic intensity),
    # then tm.
    while (_footprint_bytes(tm_eff, tf_eff, hp, xb, wb, ob) > budget
           and tf_eff > 128):
        tf_eff = max(128, (tf_eff // 2) // 128 * 128)
    while (_footprint_bytes(tm_eff, tf_eff, hp, xb, wb, ob) > budget
           and tm_eff > sub):
        tm_eff = max(sub, (tm_eff // 2) // sub * sub)

    mp = _round_up(mp, tm_eff)
    fp = _round_up(fp, tf_eff)

    # Pad only when needed (zero cost for aligned transformer dims).  For
    # repeatedly-called models with unaligned hidden/ffn, pre-pad the weights
    # once outside the hot path instead of per call.
    x_p = (x2d if (mp == m and hp == hidden)
           else jnp.pad(x2d, ((0, mp - m), (0, hp - hidden))))
    w1_p = (w1 if (hp == hidden and fp == ffn)
            else jnp.pad(w1, ((0, hp - hidden), (0, fp - ffn))))
    w2_p = (w2 if (fp == ffn and hp == hidden)
            else jnp.pad(w2, ((0, fp - ffn), (0, hp - hidden))))
    b1_2d = b1.reshape(1, ffn)
    b1_p = b1_2d if fp == ffn else jnp.pad(b1_2d, ((0, 0), (0, fp - ffn)))
    b2_2d = b2.reshape(1, hidden)
    b2_p = b2_2d if hp == hidden else jnp.pad(b2_2d, ((0, 0), (0, hp - hidden)))

    grid = (mp // tm_eff, fp // tf_eff)

    need = _footprint_bytes(tm_eff, tf_eff, hp, xb, wb, ob)
    vmem_limit = int(max(budget, need + need // 4 + (2 << 20)))

    out = pl.pallas_call(
        _ffn_kernel,
        out_shape=jax.ShapeDtypeStruct((mp, hp), x.dtype),
        grid_spec=pltpu.PrefetchScalarGridSpec(
            num_scalar_prefetch=0,
            grid=grid,
            in_specs=[
                pl.BlockSpec((tm_eff, hp), lambda i, j: (i, 0)),    # x tile
                pl.BlockSpec((hp, tf_eff), lambda i, j: (0, j)),    # W1 tile
                pl.BlockSpec((1, tf_eff), lambda i, j: (0, j)),     # b1 tile
                pl.BlockSpec((tf_eff, hp), lambda i, j: (j, 0)),    # W2 tile
                pl.BlockSpec((1, hp), lambda i, j: (0, 0)),         # b2
            ],
            out_specs=pl.BlockSpec((tm_eff, hp), lambda i, j: (i, 0)),
            scratch_shapes=[pltpu.VMEM((tm_eff, hp), jnp.float32)],
        ),
        compiler_params=pltpu.CompilerParams(
            dimension_semantics=("parallel", "arbitrary"),
            vmem_limit_bytes=vmem_limit,
        ),
    )(x_p, w1_p, b1_p, w2_p, b2_p)

    return out[:m, :hidden].reshape(orig_shape)


def _reference(x, w1, b1, w2, b2):
    h = x @ w1 + b1
    h = 0.5 * h * (1.0 + lax.erf(h / jnp.sqrt(2.0)))
    return h @ w2 + b2


def _make_params(key, hidden, ffn_size, dtype=jnp.float32):
    k1, k2, k3, k4 = jax.random.split(key, 4)
    bound1 = 1.0 / jnp.sqrt(hidden)
    bound2 = 1.0 / jnp.sqrt(ffn_size)
    w1 = jax.random.uniform(k1, (hidden, ffn_size), dtype, -bound1, bound1)
    b1 = jax.random.uniform(k2, (ffn_size,), dtype, -bound1, bound1)
    w2 = jax.random.uniform(k3, (ffn_size, hidden), dtype, -bound2, bound2)
    b2 = jax.random.uniform(k4, (hidden,), dtype, -bound2, bound2)
    return w1, b1, w2, b2


if __name__ == "__main__":
    key = jax.random.PRNGKey(0)

    # Small shape consistent with the module's forward: [batch, seq, hidden].
    batch, seq, hidden, ffn_size = 2, 8, 32, 64
    kx, kp = jax.random.split(key)
    w1, b1, w2, b2 = _make_params(kp, hidden, ffn_size)
    x = jax.random.normal(kx, (batch, seq, hidden), jnp.float32)

    out = jax.block_until_ready(ffn_pallas(x, w1, b1, w2, b2))
    ref = _reference(x, w1, b1, w2, b2)
    assert out.shape == x.shape
    assert jnp.allclose(out, ref, atol=1e-5, rtol=1e-5), "mismatch vs reference"

    # Second check: ragged/non-128-multiple dims exercise the padding path
    # and a multi-step grid.
    batch2, seq2, hidden2, ffn2 = 3, 7, 96, 200
    kx2, kp2 = jax.random.split(jax.random.PRNGKey(1))
    w1b, b1b, w2b, b2b = _make_params(kp2, hidden2, ffn2)
    x2 = jax.random.normal(kx2, (batch2, seq2, hidden2), jnp.float32)

    out2 = jax.block_until_ready(ffn_pallas(x2, w1b, b1b, w2b, b2b))
    ref2 = _reference(x2, w1b, b1b, w2b, b2b)
    assert out2.shape == x2.shape
    assert jnp.allclose(out2, ref2, atol=1e-5, rtol=1e-5), "mismatch (padded case)"

    print("KERNEL_OK")
</pallas_src>

<mosaic_0001>
module attributes {stable_mosaic.version = 11 : i64} {
  func.func @_ffn_kernel(%arg0: i32, %arg1: i32, %arg2: memref<16x128xf32, #tpu.memory_space<vmem>>, %arg3: memref<128x128xf32, #tpu.memory_space<vmem>>, %arg4: memref<1x128xf32, #tpu.memory_space<vmem>>, %arg5: memref<128x128xf32, #tpu.memory_space<vmem>>, %arg6: memref<1x128xf32, #tpu.memory_space<vmem>>, %arg7: memref<16x128xf32, #tpu.memory_space<vmem>>, %arg8: memref<16x128xf32, #tpu.memory_space<vmem>>) attributes {dimension_semantics = [#tpu.dimension_semantics<parallel>, #tpu.dimension_semantics<arbitrary>], iteration_bounds = array<i64: 1, 1>, scalar_prefetch = 0 : i64, scratch_operands = 1 : i64, tpu.core_type = #tpu.core_type<tc>, window_params = [{transform_indices = @transform_0, window_bounds = array<i64: 16, 128>}, {transform_indices = @transform_1, window_bounds = array<i64: 128, 128>}, {transform_indices = @transform_2, window_bounds = array<i64: 1, 128>}, {transform_indices = @transform_3, window_bounds = array<i64: 128, 128>}, {pipeline_mode = #tpu.pipeline_mode<synchronous>, transform_indices = @transform_4, window_bounds = array<i64: 1, 128>}, {transform_indices = @transform_5, window_bounds = array<i64: 16, 128>}]} {
    %c0 = arith.constant 0 : index
    %c0_0 = arith.constant 0 : index
    %0 = vector.load %arg2[%c0, %c0_0] : memref<16x128xf32, #tpu.memory_space<vmem>>, vector<16x128xf32>
    %c0_1 = arith.constant 0 : index
    %c0_2 = arith.constant 0 : index
    %1 = vector.load %arg3[%c0_1, %c0_2] : memref<128x128xf32, #tpu.memory_space<vmem>>, vector<128x128xf32>
    %cst = arith.constant dense<0.000000e+00> : vector<16x128xf32>
    %2 = tpu.matmul %0, %1, %cst {dimension_numbers = #tpu.dot_dimension_numbers<[1], [0], [0], [1], [0, 0, 1, 1], [], []>} : vector<16x128xf32>, vector<128x128xf32>, vector<16x128xf32> -> vector<16x128xf32>
    %c0_3 = arith.constant 0 : index
    %c0_4 = arith.constant 0 : index
    %3 = vector.load %arg4[%c0_3, %c0_4] : memref<1x128xf32, #tpu.memory_space<vmem>>, vector<1x128xf32>
    %4 = vector.broadcast %3 : vector<1x128xf32> to vector<16x128xf32>
    %5 = arith.addf %2, %4 : vector<16x128xf32>
    %cst_5 = arith.constant 5.000000e-01 : f32
    %6 = vector.broadcast %cst_5 : f32 to vector<16x128xf32>
    %7 = arith.mulf %6, %5 : vector<16x128xf32>
    %cst_6 = arith.constant 0.707106769 : f32
    %8 = vector.broadcast %cst_6 : f32 to vector<16x128xf32>
    %9 = arith.mulf %5, %8 : vector<16x128xf32>
    %10 = math.erf %9 : vector<16x128xf32>
    %cst_7 = arith.constant 1.000000e+00 : f32
    %11 = vector.broadcast %cst_7 : f32 to vector<16x128xf32>
    %12 = arith.addf %11, %10 : vector<16x128xf32>
    %13 = arith.mulf %7, %12 : vector<16x128xf32>
    %c0_8 = arith.constant 0 : index
    %c0_9 = arith.constant 0 : index
    %14 = vector.load %arg5[%c0_8, %c0_9] : memref<128x128xf32, #tpu.memory_space<vmem>>, vector<128x128xf32>
    %cst_10 = arith.constant dense<0.000000e+00> : vector<16x128xf32>
    %15 = tpu.matmul %13, %14, %cst_10 {dimension_numbers = #tpu.dot_dimension_numbers<[1], [0], [0], [1], [0, 0, 1, 1], [], []>} : vector<16x128xf32>, vector<128x128xf32>, vector<16x128xf32> -> vector<16x128xf32>
    %c0_i32 = arith.constant 0 : i32
    %16 = arith.cmpi eq, %arg1, %c0_i32 : i32
    %17 = arith.extui %16 : i1 to i32
    %c0_i32_11 = arith.constant 0 : i32
    %18 = arith.cmpi ne, %17, %c0_i32_11 : i32
    scf.if %18 {
      %c0_16 = arith.constant 0 : index
      %c0_17 = arith.constant 0 : index
      %25 = vector.load %arg8[%c0_16, %c0_17] : memref<16x128xf32, #tpu.memory_space<vmem>>, vector<16x128xf32>
      tpu.vector_store %arg8[%c0_16, %c0_17], %15 {strides = array<i32>} : memref<16x128xf32, #tpu.memory_space<vmem>>, vector<16x128xf32>,
    } else {
    }
    %c0_i32_12 = arith.constant 0 : i32
    %19 = arith.cmpi sgt, %arg1, %c0_i32_12 : i32
    %20 = arith.extui %19 : i1 to i32
    %c0_i32_13 = arith.constant 0 : i32
    %21 = arith.cmpi ne, %20, %c0_i32_13 : i32
    scf.if %21 {
      %c0_16 = arith.constant 0 : index
      %c0_17 = arith.constant 0 : index
      %25 = vector.load %arg8[%c0_16, %c0_17] : memref<16x128xf32, #tpu.memory_space<vmem>>, vector<16x128xf32>
      %26 = arith.addf %25, %15 : vector<16x128xf32>
      %c0_18 = arith.constant 0 : index
      %c0_19 = arith.constant 0 : index
      %27 = vector.load %arg8[%c0_18, %c0_19] : memref<16x128xf32, #tpu.memory_space<vmem>>, vector<16x128xf32>
      tpu.vector_store %arg8[%c0_18, %c0_19], %26 {strides = array<i32>} : memref<16x128xf32, #tpu.memory_space<vmem>>, vector<16x128xf32>,
    } else {
    }
    %c0_i32_14 = arith.constant 0 : i32
    %22 = arith.cmpi eq, %arg1, %c0_i32_14 : i32
    %23 = arith.extui %22 : i1 to i32
    %c0_i32_15 = arith.constant 0 : i32
    %24 = arith.cmpi ne, %23, %c0_i32_15 : i32
    scf.if %24 {
      %c0_16 = arith.constant 0 : index
      %c0_17 = arith.constant 0 : index
      %25 = vector.load %arg8[%c0_16, %c0_17] : memref<16x128xf32, #tpu.memory_space<vmem>>, vector<16x128xf32>
      %c0_18 = arith.constant 0 : index
      %c0_19 = arith.constant 0 : index
      %26 = vector.load %arg6[%c0_18, %c0_19] : memref<1x128xf32, #tpu.memory_space<vmem>>, vector<1x128xf32>
      %27 = vector.broadcast %26 : vector<1x128xf32> to vector<16x128xf32>
      %28 = arith.addf %25, %27 : vector<16x128xf32>
      %c0_20 = arith.constant 0 : index
      %c0_21 = arith.constant 0 : index
      %29 = vector.load %arg7[%c0_20, %c0_21] : memref<16x128xf32, #tpu.memory_space<vmem>>, vector<16x128xf32>
      tpu.vector_store %arg7[%c0_20, %c0_21], %28 {strides = array<i32>} : memref<16x128xf32, #tpu.memory_space<vmem>>, vector<16x128xf32>,
    } else {
    }
    return
  }
  func.func @transform_0(%arg0: i32, %arg1: i32) -> (i32, i32) {
    %c0_i32 = arith.constant 0 : i32
    %c0_i32_0 = arith.constant 0 : i32
    return %arg0, %c0_i32 : i32, i32
  }
  func.func @transform_1(%arg0: i32, %arg1: i32) -> (i32, i32) {
    %c0_i32 = arith.constant 0 : i32
    %c0_i32_0 = arith.constant 0 : i32
    return %c0_i32, %arg1 : i32, i32
  }
  func.func @transform_2(%arg0: i32, %arg1: i32) -> (i32, i32) {
    %c0_i32 = arith.constant 0 : i32
    %c0_i32_0 = arith.constant 0 : i32
    return %c0_i32, %arg1 : i32, i32
  }
  func.func @transform_3(%arg0: i32, %arg1: i32) -> (i32, i32) {
    %c0_i32 = arith.constant 0 : i32
    %c0_i32_0 = arith.constant 0 : i32
    return %arg1, %c0_i32 : i32, i32
  }
  func.func @transform_4(%arg0: i32, %arg1: i32) -> (i32, i32) {
    %c0_i32 = arith.constant 0 : i32
    %c0_i32_0 = arith.constant 0 : i32
    %c0_i32_1 = arith.constant 0 : i32
    return %c0_i32, %c0_i32_0 : i32, i32
  }
  func.func @transform_5(%arg0: i32, %arg1: i32) -> (i32, i32) {
    %c0_i32 = arith.constant 0 : i32
    %c0_i32_0 = arith.constant 0 : i32
    return %arg0, %c0_i32 : i32, i32
  }
}

</mosaic_0001>

<bundles_post_ra>
// kernel: ffn_pallas.1
= control target key start
LH: loop header
LB: loop body
LE: loop exit
PB: predicated region body
PF: predicated region fallthrough
CT: control target
= control target key end

     0   :  { %s513_s1 = inlined_call_operand.vmem [shape: f32[128,128], index: 1, kind: input, shape index: {}]   ;;  %s514_s0 = inlined_call_operand.vmem [shape: f32[16,128], index: 0, kind: input, shape index: {}]   ;;  %s515_s3 = inlined_call_operand.vmem [shape: f32[128,128], index: 3, kind: input, shape index: {}]   ;;  %s516_s2 = inlined_call_operand.vmem [shape: f32[1,128], index: 2, kind: input, shape index: {}]   ;;  %s517_s4 = inlined_call_operand.vmem [shape: f32[1,128], index: 4, kind: input, shape index: {}]   ;;  %s518_s5 = inlined_call_operand.vmem [shape: f32[16,128], index: 5, kind: output, shape index: {}]  }
   0x1   :  { %v37_v0 = vld [vmem:[%s513_s1 + $0x78] sm:$0xff]  ;;  %v36_v1 = vld [vmem:[%s513_s1 + $0x70] sm:$0xff]  ;;  %v35_v2 = vld [vmem:[%s513_s1 + $0x68] sm:$0xff] }
   0x2   :  { %295 = vmatprep.subr.mxu0 %v37_v0  ;;  %v34_v3 = vld [vmem:[%s513_s1 + $0x60] sm:$0xff]  ;;  %v33_v5 = vld [vmem:[%s513_s1 + $0x58] sm:$0xff]  ;;  %v144_v7 = vld [vmem:[%s515_s3 + $0x70] sm:$0xff] }
   0x3   :  { %296 = vmatpush3.msra.mxu0 %v37_v0  ;;  %v20_v4 = vld [vmem:[%s514_s0] sm:$0xff]  ;;  %v145_v6 = vld [vmem:[%s515_s3 + $0x78] sm:$0xff]  ;;  %v32_v8 = vld [vmem:[%s513_s1 + $0x50] sm:$0xff] }
   0x4   :  { %297 = vmatprep.subr.mxu0 %v36_v1  ;;  %327 = vmatprep.mubr.f32.mxu0 %v20_v4  ;;  %v143_v9 = vld [vmem:[%s515_s3 + $0x68] sm:$0xff]  ;;  %v30_v11 = vld [vmem:[%s513_s1 + $0x40] sm:$0xff]  ;;  %v29_v12 = vld [vmem:[%s513_s1 + $0x38] sm:$0xff] }
   0x5   :  { %298 = vmatpush3.msra.mxu0 %v36_v1  ;;  %330 = vmatprep.subr.mxu1 %v145_v6  ;;  %v31_v10 = vld [vmem:[%s513_s1 + $0x48] sm:$0xff]  ;;  %v28_v13 = vld [vmem:[%s513_s1 + $0x30] sm:$0xff]  ;;  %v26_v15 = vld [vmem:[%s513_s1 + $0x20] sm:$0xff] }
   0x6   :  { %299 = vmatprep.subr.mxu0 %v35_v2  ;;  %331 = vmatpush3.msra.mxu1 %v145_v6  ;;  %v27_v14 = vld [vmem:[%s513_s1 + $0x28] sm:$0xff]  ;;  %v25_v16 = vld [vmem:[%s513_s1 + $0x18] sm:$0xff]  ;;  %v24_v17 = vld [vmem:[%s513_s1 + $0x10] sm:$0xff] }
   0x7   :  { %300 = vmatpush3.msra.mxu0 %v35_v2  ;;  %332 = vmatprep.subr.mxu1 %v144_v7  ;;  %v23_v18 = vld [vmem:[%s513_s1 + $0x8] sm:$0xff]  ;;  %v22_v19 = vld [vmem:[%s513_s1] sm:$0xff]  ;;  %v141_v22 = vld [vmem:[%s515_s3 + $0x58] sm:$0xff] }
   0x8   :  { %301 = vmatprep.subr.mxu0 %v34_v3  ;;  %333 = vmatpush3.msra.mxu1 %v144_v7  ;;  %v21_v20 = vld [vmem:[%s514_s0 + $0x8] sm:$0xff]  ;;  %v142_v21 = vld [vmem:[%s515_s3 + $0x60] sm:$0xff]  ;;  %v140_v23 = vld [vmem:[%s515_s3 + $0x50] sm:$0xff] }
   0x9   :  { %302 = vmatpush3.msra.mxu0 %v34_v3  ;;  %334 = vmatprep.subr.mxu1 %v143_v9  ;;  %v139_v24 = vld [vmem:[%s515_s3 + $0x48] sm:$0xff]  ;;  %v138_v25 = vld [vmem:[%s515_s3 + $0x40] sm:$0xff]  ;;  %v137_v26 = vld [vmem:[%s515_s3 + $0x38] sm:$0xff] }
   0xa   :  { %303 = vmatprep.subr.mxu0 %v33_v5  ;;  %335 = vmatpush3.msra.mxu1 %v143_v9  ;;  %v136_v27 = vld [vmem:[%s515_s3 + $0x30] sm:$0xff]  ;;  %v135_v28 = vld [vmem:[%s515_s3 + $0x28] sm:$0xff]  ;;  %v134_v29 = vld [vmem:[%s515_s3 + $0x20] sm:$0xff] }
   0xb   :  { %304 = vmatpush3.msra.mxu0 %v33_v5  ;;  %336 = vmatprep.subr.mxu1 %v142_v21  ;;  %v133_v30 = vld [vmem:[%s515_s3 + $0x18] sm:$0xff]  ;;  %v132_v31 = vld [vmem:[%s515_s3 + $0x10] sm:$0xff]  ;;  %v131_v32 = vld [vmem:[%s515_s3 + $0x8] sm:$0xff] }
   0xc   :  { %305 = vmatprep.subr.mxu0 %v32_v8  ;;  %337 = vmatpush3.msra.mxu1 %v142_v21  ;;  %v130_v33 = vld [vmem:[%s515_s3] sm:$0xff] }
   0xd   :  { %306 = vmatpush3.msra.mxu0 %v32_v8  ;;  %338 = vmatprep.subr.mxu1 %v141_v22  ;;  %v257_v34 = vld [vmem:[%s516_s2] ss:$0 sm:$0xff] }
   0xe   :  { %307 = vmatprep.subr.mxu0 %v31_v10  ;;  %339 = vmatpush3.msra.mxu1 %v141_v22  ;;  %v258_v49 = vld [vmem:[%s517_s4] ss:$0 sm:$0xff] }
   0xf   :  { %308 = vmatpush3.msra.mxu0 %v31_v10  ;;  %340 = vmatprep.subr.mxu1 %v140_v23 }
  0x10   :  { %309 = vmatprep.subr.mxu0 %v30_v11  ;;  %341 = vmatpush3.msra.mxu1 %v140_v23 }
  0x11   :  { %310 = vmatpush3.msra.mxu0 %v30_v11  ;;  %342 = vmatprep.subr.mxu1 %v139_v24 }
  0x12   :  { %311 = vmatprep.subr.mxu0 %v29_v12  ;;  %343 = vmatpush3.msra.mxu1 %v139_v24 }
  0x13   :  { %312 = vmatpush3.msra.mxu0 %v29_v12  ;;  %344 = vmatprep.subr.mxu1 %v138_v25 }
  0x14   :  { %313 = vmatprep.subr.mxu0 %v28_v13  ;;  %345 = vmatpush3.msra.mxu1 %v138_v25 }
  0x15   :  { %314 = vmatpush3.msra.mxu0 %v28_v13  ;;  %346 = vmatprep.subr.mxu1 %v137_v26 }
  0x16   :  { %315 = vmatprep.subr.mxu0 %v27_v14  ;;  %347 = vmatpush3.msra.mxu1 %v137_v26 }
  0x17   :  { %316 = vmatpush3.msra.mxu0 %v27_v14  ;;  %348 = vmatprep.subr.mxu1 %v136_v27 }
  0x18   :  { %317 = vmatprep.subr.mxu0 %v26_v15  ;;  %349 = vmatpush3.msra.mxu1 %v136_v27 }
  0x19   :  { %318 = vmatpush3.msra.mxu0 %v26_v15  ;;  %350 = vmatprep.subr.mxu1 %v135_v28 }
  0x1a   :  { %319 = vmatprep.subr.mxu0 %v25_v16  ;;  %351 = vmatpush3.msra.mxu1 %v135_v28 }
  0x1b   :  { %320 = vmatpush3.msra.mxu0 %v25_v16  ;;  %352 = vmatprep.subr.mxu1 %v134_v29 }
  0x1c   :  { %321 = vmatprep.subr.mxu0 %v24_v17  ;;  %353 = vmatpush3.msra.mxu1 %v134_v29 }
  0x1d   :  { %322 = vmatpush3.msra.mxu0 %v24_v17  ;;  %354 = vmatprep.subr.mxu1 %v133_v30 }
  0x1e   :  { %323 = vmatprep.subr.mxu0 %v23_v18  ;;  %355 = vmatpush3.msra.mxu1 %v133_v30 }
  0x1f   :  { %324 = vmatpush3.msra.mxu0 %v23_v18  ;;  %356 = vmatprep.subr.mxu1 %v132_v31 }
  0x20   :  { %325 = vmatprep.subr.mxu0 %v22_v19  ;;  %357 = vmatpush3.msra.mxu1 %v132_v31 }
  0x21   :  { %326 = vmatpush3.msra.mxu0 %v22_v19  ;;  %358 = vmatprep.subr.mxu1 %v131_v32 }
  0x22   :  { %328 = vmatmul.mubr.f32.vlgmr.msra.gmra.mxu0 %v21_v20  ;;  %359 = vmatpush3.msra.mxu1 %v131_v32 }
  0x23   :  { %360 = vmatprep.subr.mxu1 %v130_v33 }
  0x24   :  { %361 = vmatpush3.msra.mxu1 %v130_v33 }
  0xe2   :  { %v329_v35 = vpop.f32.mrf.mxu0 }
  0xe3   :  { %v117_v36 = vadd.f32 %v329_v35, %v257_v34 }
  0xe4   :  { %v111_v37 = vpop.f32.mrf.mxu0 }
  0xe5   :  { %v123_v38 = vmul.f32 0.70710677, %v117_v36  ;;  %v112_v39 = vadd.f32 %v257_v34, %v111_v37  ;;  %v121_v46 = vmul.f32 0.5, %v117_v36 }
  0xe7   :  { %365 = verf.f32 %v123_v38  ;;  %v122_v40 = vmul.f32 0.70710677, %v112_v39  ;;  %v120_v44 = vmul.f32 0.5, %v112_v39 }
  0xe9   :  { %367 = verf.f32 %v122_v40 }
  0xf4   :  { %v366_v41 = vpop.eup %365 }
  0xf5   :  { %v127_v43 = vadd.f32 1.0, %v366_v41 }
  0xf6   :  { %v368_v42 = vpop.eup %367 }
  0xf7   :  { %v126_v45 = vadd.f32 1.0, %v368_v42  ;;  %v129_v48 = vmul.f32 %v127_v43, %v121_v46 }
  0xf9   :  { %v128_v47 = vmul.f32 %v126_v45, %v120_v44 }
  0xfb   :  { %362 = vmatprep.mubr.f32.mxu1 %v128_v47 }
  0xfc   :  { %363 = vmatmul.mubr.f32.vlgmr.msra.gmra.mxu1 %v129_v48 }
 0x1bc   :  { %v364_v50 = vpop.f32.mrf.mxu1 }
 0x1bd   :  { %v250_v51 = vadd.f32 %v364_v50, %v258_v49 }
 0x1be   :  { %v212_v52 = vpop.f32.mrf.mxu1 }
 0x1bf   :  { %252 = vst [vmem:[%s518_s5 + $0x8] sm:$0xff] %v250_v51  ;;  %v249_v53 = vadd.f32 %v258_v49, %v212_v52 }
 0x1c1   :  { %251 = vst [vmem:[%s518_s5] sm:$0xff] %v249_v53 }

</bundles_post_ra>
